<compile_context>
chip_gen: v7x
topology: tpu7x:2x2x1
jax: 0.10.0
libtpu: 0.0.40
codegen_flags: <defaults>
</compile_context>

<pallas_src>
import functools

import jax
import jax.numpy as jnp
from jax.experimental import pallas as pl
from jax.experimental.pallas import tpu as pltpu

_EPS = 1e-5
_VMEM_LIMIT = 32 * 1024 * 1024   # <= physical VMEM on v5e/v6e/v7x


def _round_up(x, m):
    return (x + m - 1) // m * m


# ---------------------------------------------------------------------------
# Matmul (im2col conv path) with fused BatchNorm column statistics
# ---------------------------------------------------------------------------

def _mm_stats_kernel_1k(a_ref, b_ref, o_ref, ssum_ref, ssq_ref):
    """Single-K-step matmul: no accumulator scratch, stats from the f32 result."""
    acc = jnp.dot(a_ref[...], b_ref[...], preferred_element_type=jnp.float32)
    ssum_ref[...] = jnp.sum(acc, axis=0, keepdims=True)
    ssq_ref[...] = jnp.sum(acc * acc, axis=0, keepdims=True)
    o_ref[...] = acc.astype(o_ref.dtype)


def _mm_stats_kernel(a_ref, b_ref, o_ref, ssum_ref, ssq_ref, acc_ref):
    """K-tiled matmul with f32 VMEM accumulator; stats emitted on the last K step."""
    k = pl.program_id(2)

    @pl.when(k == 0)
    def _():
        acc_ref[...] = jnp.zeros_like(acc_ref)

    acc_ref[...] += jnp.dot(a_ref[...], b_ref[...],
                            preferred_element_type=jnp.float32)

    @pl.when(k == pl.num_programs(2) - 1)
    def _():
        acc = acc_ref[...]
        ssum_ref[...] = jnp.sum(acc, axis=0, keepdims=True)
        ssq_ref[...] = jnp.sum(acc * acc, axis=0, keepdims=True)
        o_ref[...] = acc.astype(o_ref.dtype)


def pallas_matmul_stats(a, w):
    """(M,K) @ (K,N) bf16 -> bf16 out + per-column sum / sum-of-squares (f32).

    Zero-padded M rows contribute nothing to the statistics (no bias here).
    """
    M, K = a.shape
    Kw, Np = w.shape
    assert Kw == K

    tm = _round_up(M, 16) if M <= 512 else 512          # prefer big M tiles
    Mp = _round_up(M, tm)
    tn = Np if Np <= 512 else 512
    assert Np % tn == 0

    a_p = a.astype(jnp.bfloat16)
    if Mp != M:
        a_p = jnp.pad(a_p, ((0, Mp - M), (0, 0)))

    mb, nb = Mp // tm, Np // tn
    out_shapes = (jax.ShapeDtypeStruct((Mp, Np), jnp.bfloat16),
                  jax.ShapeDtypeStruct((mb, 1, Np), jnp.float32),
                  jax.ShapeDtypeStruct((mb, 1, Np), jnp.float32))

    if K <= 1024:
        # Fast path: one K step, no accumulator scratch, no K zero-padding.
        grid = (mb, nb)
        in_specs = [pl.BlockSpec((tm, K), lambda i, j: (i, 0)),
                    pl.BlockSpec((K, tn), lambda i, j: (0, j))]
        out_specs = (pl.BlockSpec((tm, tn), lambda i, j: (i, j)),
                     pl.BlockSpec((None, 1, tn), lambda i, j: (i, 0, j)),
                     pl.BlockSpec((None, 1, tn), lambda i, j: (i, 0, j)))
        kernel, scratch = _mm_stats_kernel_1k, []
        sem = ("parallel", "parallel")
    else:
        tk = None
        for c in (768, 512, 384, 256, 128):              # all K here divide cleanly
            if K % c == 0:
                tk = c
                break
        assert tk is not None, f"unsupported K={K}"
        grid = (mb, nb, K // tk)
        in_specs = [pl.BlockSpec((tm, tk), lambda i, j, k: (i, k)),
                    pl.BlockSpec((tk, tn), lambda i, j, k: (k, j))]
        out_specs = (pl.BlockSpec((tm, tn), lambda i, j, k: (i, j)),
                     pl.BlockSpec((None, 1, tn), lambda i, j, k: (i, 0, j)),
                     pl.BlockSpec((None, 1, tn), lambda i, j, k: (i, 0, j)))
        kernel, scratch = _mm_stats_kernel, [pltpu.VMEM((tm, tn), jnp.float32)]
        sem = ("parallel", "parallel", "arbitrary")

    out, ps, pq = pl.pallas_call(
        kernel,
        out_shape=out_shapes,
        grid=grid,
        in_specs=in_specs,
        out_specs=out_specs,
        scratch_shapes=scratch,
        compiler_params=pltpu.CompilerParams(
            dimension_semantics=sem, vmem_limit_bytes=_VMEM_LIMIT),
    )(a_p, w)

    col_sum = jnp.sum(ps, axis=(0, 1)).reshape(1, Np)
    col_sq = jnp.sum(pq, axis=(0, 1)).reshape(1, Np)
    return (out[:M] if Mp != M else out), col_sum, col_sq


# ---------------------------------------------------------------------------
# Direct 3x3 stride-1 conv kernel (no im2col) + fused BN statistics
# ---------------------------------------------------------------------------

def _conv3x3_kernel(x_ref, w_ref, m_ref, o_ref, ssum_ref, ssq_ref, *, cin, wp, l):
    """9-tap direct conv on a flattened padded image.

    x_ref: (Lx, Cin) — padded image flattened (row-major), so tap (i,j) is a
    contiguous slice starting at i*Wp + j.  Output rows are (Ho*Wp): the last
    2 columns of every output row are wrap-around garbage and are excluded
    from the BN statistics via the precomputed column mask m_ref.
    """
    acc = jnp.zeros((l, o_ref.shape[-1]), jnp.float32)
    for t in range(9):
        off = (t // 3) * wp + (t % 3)
        a = x_ref[pl.ds(off, l), :]
        wt = w_ref[pl.ds(t * cin, cin), :]
        acc = acc + jnp.dot(a, wt, preferred_element_type=jnp.float32)
    masked = acc * m_ref[...]
    ssum_ref[...] = jnp.sum(masked, axis=0, keepdims=True)
    ssq_ref[...] = jnp.sum(masked * acc, axis=0, keepdims=True)
    o_ref[...] = acc.astype(o_ref.dtype)


def conv3x3_s1_stats(x_nhwc, wspec):
    """PyTorch Conv2d(k=3, s=1, p=1, no bias) without im2col, + BN column stats."""
    N, H, W, Cin = x_nhwc.shape
    Cout = wspec["w"].shape[1]
    Hp, Wp = H + 2, W + 2
    Ho, Wo = H, W
    L = Ho * Wp

    # Pad spatially (one extra bottom row so the last tap's window stays in
    # bounds) and flatten (H, W): every tap becomes one contiguous row slice.
    xp = jnp.pad(x_nhwc.astype(jnp.bfloat16), ((0, 0), (1, 2), (1, 1), (0, 0)))
    Lx = (Hp + 1) * Wp
    xf = xp.reshape(N, Lx, Cin)

    # Static column-validity mask (drops the 2 wrap-around columns per row).
    mask = ((jnp.arange(L) % Wp) < Wo).astype(jnp.float32).reshape(L, 1)

    out, ps, pq = pl.pallas_call(
        functools.partial(_conv3x3_kernel, cin=Cin, wp=Wp, l=L),
        out_shape=(jax.ShapeDtypeStruct((N, L, Cout), jnp.bfloat16),
                   jax.ShapeDtypeStruct((N, 1, Cout), jnp.float32),
                   jax.ShapeDtypeStruct((N, 1, Cout), jnp.float32)),
        grid=(N,),
        in_specs=[pl.BlockSpec((None, Lx, Cin), lambda n: (n, 0, 0)),
                  pl.BlockSpec((9 * Cin, Cout), lambda n: (0, 0)),
                  pl.BlockSpec((L, 1), lambda n: (0, 0))],
        out_specs=(pl.BlockSpec((None, L, Cout), lambda n: (n, 0, 0)),
                   pl.BlockSpec((None, 1, Cout), lambda n: (n, 0, 0)),
                   pl.BlockSpec((None, 1, Cout), lambda n: (n, 0, 0))),
        compiler_params=pltpu.CompilerParams(
            dimension_semantics=("parallel",), vmem_limit_bytes=_VMEM_LIMIT),
    )(xf, wspec["w"], mask)

    out = out.reshape(N, Ho, Wp, Cout)[:, :, :Wo, :]    # drop garbage columns
    col_sum = jnp.sum(ps, axis=(0, 1)).reshape(1, Cout)
    col_sq = jnp.sum(pq, axis=(0, 1)).reshape(1, Cout)
    return out, col_sum, col_sq


# ---------------------------------------------------------------------------
# Single-pass BatchNorm apply (scale/shift precomputed from epilogue stats),
# optionally fused with the shortcut-branch BN + residual add + ReLU.
# ---------------------------------------------------------------------------

def _scale_shift_kernel(*refs, relu, has_res):
    if has_res:
        x_ref, r_ref, sc_ref, sh_ref, rsc_ref, rsh_ref, o_ref = refs
    else:
        x_ref, sc_ref, sh_ref, o_ref = refs
    y = x_ref[...].astype(jnp.float32) * sc_ref[...] + sh_ref[...]
    if has_res:
        y = y + r_ref[...].astype(jnp.float32) * rsc_ref[...] + rsh_ref[...]
    if relu:
        y = jnp.maximum(y, 0.0)
    o_ref[...] = y.astype(o_ref.dtype)


def _bn_scale_shift(col_sum, col_sq, count, gamma, beta):
    """Fold train-mode (biased) BN stats into a per-channel scale/shift."""
    mean = col_sum / count
    var = jnp.maximum(col_sq / count - mean * mean, 0.0)
    scale = gamma * jax.lax.rsqrt(var + _EPS)
    shift = beta - mean * scale
    return scale, shift


def pallas_bn_apply(x2d, scale, shift, relu=False,
                    residual=None, res_scale=None, res_shift=None):
    """Single-pass y = x*scale+shift (+ residual*res_scale+res_shift) (+ReLU)."""
    R, C = x2d.shape
    has_res = residual is not None

    # ~1 MiB bf16 row tiles: safe on v5e's 16 MiB default scoped VMEM even
    # with a fused residual, and keeps f32 temporaries small on v7x.
    cap = max(16, ((1 << 20) // (C * 2)) // 16 * 16)
    tr = _round_up(R, 16) if R <= cap else cap
    Rp = _round_up(R, tr)

    xp = x2d if Rp == R else jnp.pad(x2d, ((0, Rp - R), (0, 0)))
    ops = [xp]
    in_specs = [pl.BlockSpec((tr, C), lambda j: (j, 0))]
    if has_res:
        rp = residual if Rp == R else jnp.pad(residual, ((0, Rp - R), (0, 0)))
        ops += [rp, scale, shift, res_scale, res_shift]
        in_specs += [pl.BlockSpec((tr, C), lambda j: (j, 0))]
        in_specs += [pl.BlockSpec((1, C), lambda j: (0, 0))] * 4
    else:
        ops += [scale, shift]
        in_specs += [pl.BlockSpec((1, C), lambda j: (0, 0))] * 2

    out = pl.pallas_call(
        functools.partial(_scale_shift_kernel, relu=relu, has_res=has_res),
        out_shape=jax.ShapeDtypeStruct((Rp, C), jnp.bfloat16),
        grid=(Rp // tr,),
        in_specs=in_specs,
        out_specs=pl.BlockSpec((tr, C), lambda j: (j, 0)),
        compiler_params=pltpu.CompilerParams(
            dimension_semantics=("parallel",),      # both TCs usable (v7x)
            vmem_limit_bytes=_VMEM_LIMIT),
    )(*ops)
    return out[:R] if Rp != R else out


def apply_bn_nhwc(x_nhwc, scale, shift, relu=False, residual=None,
                  res_scale=None, res_shift=None):
    N, H, W, C = x_nhwc.shape
    r = None if residual is None else residual.reshape(N * H * W, C)
    y = pallas_bn_apply(x_nhwc.reshape(N * H * W, C), scale, shift, relu=relu,
                        residual=r, res_scale=res_scale, res_shift=res_shift)
    return y.reshape(N, H, W, C)


# ---------------------------------------------------------------------------
# Global average pool (AdaptiveAvgPool2d(1) + flatten)
# ---------------------------------------------------------------------------

def _gap_kernel(x_ref, o_ref, *, inv_hw):
    x = x_ref[...].astype(jnp.float32)
    o_ref[...] = (jnp.sum(x, axis=1) * inv_hw).astype(o_ref.dtype)


def pallas_global_avgpool(x_nhwc):
    N, H, W, C = x_nhwc.shape
    HW = H * W
    x = x_nhwc.reshape(N, HW, C)
    tb = N if N <= 256 else 256
    Nb = _round_up(N, tb)
    if Nb != N:
        x = jnp.pad(x, ((0, Nb - N), (0, 0), (0, 0)))
    out = pl.pallas_call(
        functools.partial(_gap_kernel, inv_hw=1.0 / HW),
        out_shape=jax.ShapeDtypeStruct((Nb, C), jnp.float32),
        grid=(Nb // tb,),
        in_specs=[pl.BlockSpec((tb, HW, C), lambda i: (i, 0, 0))],
        out_specs=pl.BlockSpec((tb, C), lambda i: (i, 0)),
        compiler_params=pltpu.CompilerParams(dimension_semantics=("parallel",)),
    )(x)
    return out[:N] if Nb != N else out


# ---------------------------------------------------------------------------
# Fully fused SimSiam heads: proj(Lin+BN+ReLU, Lin+BN) + pred(Lin+BN+ReLU, Lin+b)
# ---------------------------------------------------------------------------

def _heads_kernel(f_ref, w1p_ref, g1p_ref, b1p_ref, w2p_ref, g2p_ref, b2p_ref,
                  w1q_ref, g1q_ref, b1q_ref, w2q_ref, bq_ref,
                  z_ref, p_ref, *, m, mp):
    inv_m = 1.0 / m
    row_ok = jax.lax.broadcasted_iota(jnp.int32, (mp, 1), 0) < m

    def bn(y, g, b):
        # Padded rows are kept at exactly zero before every matmul, so sums
        # over all mp rows divided by the real batch m give exact train stats.
        mean = jnp.sum(y, axis=0, keepdims=True) * inv_m
        var = jnp.maximum(
            jnp.sum(y * y, axis=0, keepdims=True) * inv_m - mean * mean, 0.0)
        return (y - mean) * jax.lax.rsqrt(var + _EPS) * g + b

    f = f_ref[...].astype(jnp.bfloat16)

    # Projection head.
    h = jnp.dot(f, w1p_ref[...], preferred_element_type=jnp.float32)
    h = jnp.where(row_ok, jnp.maximum(bn(h, g1p_ref[...], b1p_ref[...]), 0.0), 0.0)
    z = jnp.dot(h.astype(jnp.bfloat16), w2p_ref[...],
                preferred_element_type=jnp.float32)
    z = jnp.where(row_ok, bn(z, g2p_ref[...], b2p_ref[...]), 0.0)
    z_ref[...] = z

    # Prediction head.
    h = jnp.dot(z.astype(jnp.bfloat16), w1q_ref[...],
                preferred_element_type=jnp.float32)
    h = jnp.where(row_ok, jnp.maximum(bn(h, g1q_ref[...], b1q_ref[...]), 0.0), 0.0)
    p_ref[...] = jnp.dot(h.astype(jnp.bfloat16), w2q_ref[...],
                         preferred_element_type=jnp.float32) + bq_ref[...]


def pallas_heads(f, proj, pred):
    """Both SimSiam heads fused into a single Pallas call (weights stay in VMEM)."""
    M, _ = f.shape
    Mp = max(16, _round_up(M, 16))
    fp = f.astype(jnp.float32)
    if Mp != M:
        fp = jnp.pad(fp, ((0, Mp - M), (0, 0)))
    z, p = pl.pallas_call(
        functools.partial(_heads_kernel, m=M, mp=Mp),
        out_shape=(jax.ShapeDtypeStruct((Mp, 2048), jnp.float32),
                   jax.ShapeDtypeStruct((Mp, 2048), jnp.float32)),
        compiler_params=pltpu.CompilerParams(vmem_limit_bytes=_VMEM_LIMIT),
    )(fp, proj["w1"], proj["bn1_g"], proj["bn1_b"],
      proj["w2"], proj["bn2_g"], proj["bn2_b"],
      pred["w1"], pred["bn1_g"], pred["bn1_b"],
      pred["w2"], pred["b2"])
    return z[:M], p[:M]


# ---------------------------------------------------------------------------
# Glue: conv dispatch, ResNet blocks, forward
# ---------------------------------------------------------------------------

def conv2d_im2col_stats(x_nhwc, wspec, stride, padding):
    """PyTorch Conv2d (cross-correlation, no bias) via im2col + MXU matmul + stats."""
    N, H, W, Cin = x_nhwc.shape
    kh, kw = wspec["kh"], wspec["kw"]
    Cout = wspec["w"].shape[1]

    xp = x_nhwc
    if padding:
        xp = jnp.pad(x_nhwc, ((0, 0), (padding, padding), (padding, padding), (0, 0)))
    Hp, Wp = xp.shape[1], xp.shape[2]
    Ho = (Hp - kh) // stride + 1
    Wo = (Wp - kw) // stride + 1

    if kh == 1 and kw == 1:
        patches = xp[:, ::stride, ::stride, :] if stride > 1 else xp
    else:
        cols = []
        for i in range(kh):
            for j in range(kw):
                cols.append(xp[:, i:i + (Ho - 1) * stride + 1:stride,
                               j:j + (Wo - 1) * stride + 1:stride, :])
        patches = jnp.concatenate(cols, axis=-1)     # (N,Ho,Wo,kh*kw*Cin), (i,j,c) order

    a = patches.reshape(N * Ho * Wo, kh * kw * Cin)
    out, cs, cq = pallas_matmul_stats(a, wspec["w"])
    return out.reshape(N, Ho, Wo, Cout), cs, cq


def _conv_with_stats(x, wspec, stride, padding):
    if wspec["kh"] == 3 and stride == 1 and wspec["cin"] > 1:
        return conv3x3_s1_stats(x, wspec)            # direct, no im2col
    return conv2d_im2col_stats(x, wspec, stride, padding)


def basic_block(x, p):
    stride = p["stride"]

    h, s1, q1 = _conv_with_stats(x, p["conv1"], stride, 1)
    cnt1 = h.shape[0] * h.shape[1] * h.shape[2]
    sc1, sh1 = _bn_scale_shift(s1, q1, cnt1, p["bn1_g"], p["bn1_b"])
    h = apply_bn_nhwc(h, sc1, sh1, relu=True)

    h2, s2, q2 = _conv_with_stats(h, p["conv2"], 1, 1)
    cnt2 = h2.shape[0] * h2.shape[1] * h2.shape[2]
    sc2, sh2 = _bn_scale_shift(s2, q2, cnt2, p["bn2_g"], p["bn2_b"])

    if "sc" in p:
        r, ss, sq = conv2d_im2col_stats(x, p["sc"], stride, 0)
        rsc, rsh = _bn_scale_shift(ss, sq, cnt2, p["sc_g"], p["sc_b"])
    else:
        r = x
        C = h2.shape[-1]
        rsc = jnp.ones((1, C), jnp.float32)
        rsh = jnp.zeros((1, C), jnp.float32)

    # bn2 + shortcut-BN + residual add + ReLU: one single-pass kernel.
    return apply_bn_nhwc(h2, sc2, sh2, relu=True,
                         residual=r, res_scale=rsc, res_shift=rsh)


def simsiam_forward(x_nchw, params):
    # backbone = Sequential(conv1, bn1, layer1..layer4, AdaptiveAvgPool2d(1))
    # NOTE: the functional relu after bn1 is lost by Sequential(*children()) — on purpose.
    x = jnp.transpose(x_nchw, (0, 2, 3, 1)).astype(jnp.bfloat16)   # NCHW -> NHWC
    x, cs, cq = conv2d_im2col_stats(x, params["conv1"], 1, 1)      # Cin=1 -> im2col
    cnt = x.shape[0] * x.shape[1] * x.shape[2]
    sc, sh = _bn_scale_shift(cs, cq, cnt, params["bn1_g"], params["bn1_b"])
    x = apply_bn_nhwc(x, sc, sh, relu=False)

    for li in range(1, 5):
        for blk in params[f"layer{li}"]:
            x = basic_block(x, blk)

    f = pallas_global_avgpool(x)                                   # (N, 512)
    z, p = pallas_heads(f, params["proj"], params["pred"])
    return jax.lax.stop_gradient(z), p                             # (z.detach(), p)


# ---------------------------------------------------------------------------
# Deterministic parameter init (shapes follow the torch module __init__).
# Weights are pre-transposed to (kh*kw*Cin, Cout) bf16 once (no K padding).
# ---------------------------------------------------------------------------

def _winit(key, shape, scale=0.05):
    return scale * jax.random.normal(key, shape, dtype=jnp.float32)


def _prep_conv_w(w_oihw):
    """(Cout,Cin,kh,kw) -> bf16 (kh*kw*Cin, Cout), rows in (i,j,c) order."""
    Cout, Cin, kh, kw = w_oihw.shape
    wmat = jnp.transpose(w_oihw, (2, 3, 1, 0)).reshape(kh * kw * Cin, Cout)
    return {"w": wmat.astype(jnp.bfloat16), "kh": kh, "kw": kw,
            "cin": Cin, "cout": Cout}


def init_simsiam_params(key):
    keys = iter(jax.random.split(key, 64))
    params = {}

    # First conv was Conv2d(3, 64, 3, s=1, p=1); patch_first_conv sums over in-channels.
    w0 = _winit(next(keys), (64, 3, 3, 3))
    params["conv1"] = _prep_conv_w(jnp.sum(w0, axis=1, keepdims=True))   # (64,1,3,3)
    params["bn1_g"] = jnp.ones((1, 64), jnp.float32)
    params["bn1_b"] = jnp.zeros((1, 64), jnp.float32)

    layer_cfg = [(64, 1, 2), (128, 2, 2), (256, 2, 2), (512, 2, 2)]  # (planes, stride, n_blocks)
    in_planes = 64
    for li, (planes, lstride, nblocks) in enumerate(layer_cfg, start=1):
        blocks = []
        for bi in range(nblocks):
            stride = lstride if bi == 0 else 1
            blk = {"stride": stride}
            blk["conv1"] = _prep_conv_w(_winit(next(keys), (planes, in_planes, 3, 3)))
            blk["bn1_g"] = jnp.ones((1, planes), jnp.float32)
            blk["bn1_b"] = jnp.zeros((1, planes), jnp.float32)
            blk["conv2"] = _prep_conv_w(_winit(next(keys), (planes, planes, 3, 3)))
            blk["bn2_g"] = jnp.ones((1, planes), jnp.float32)
            blk["bn2_b"] = jnp.zeros((1, planes), jnp.float32)
            if stride != 1 or in_planes != planes:
                blk["sc"] = _prep_conv_w(_winit(next(keys), (planes, in_planes, 1, 1)))
                blk["sc_g"] = jnp.ones((1, planes), jnp.float32)
                blk["sc_b"] = jnp.zeros((1, planes), jnp.float32)
            blocks.append(blk)
            in_planes = planes
        params[f"layer{li}"] = blocks

    # ProjectionHead([(512,2048,BN,ReLU),(2048,2048,BN,None)]) — linears have no bias.
    params["proj"] = {
        "w1": _winit(next(keys), (512, 2048)).astype(jnp.bfloat16),
        "bn1_g": jnp.ones((1, 2048), jnp.float32), "bn1_b": jnp.zeros((1, 2048), jnp.float32),
        "w2": _winit(next(keys), (2048, 2048)).astype(jnp.bfloat16),
        "bn2_g": jnp.ones((1, 2048), jnp.float32), "bn2_b": jnp.zeros((1, 2048), jnp.float32),
    }
    # SimSiamPredictionHead(2048, 512, 2048): Linear(no bias)+BN+ReLU, Linear(bias).
    params["pred"] = {
        "w1": _winit(next(keys), (2048, 512)).astype(jnp.bfloat16),
        "bn1_g": jnp.ones((1, 512), jnp.float32), "bn1_b": jnp.zeros((1, 512), jnp.float32),
        "w2": _winit(next(keys), (512, 2048)).astype(jnp.bfloat16),
        "b2": jnp.zeros((1, 2048), jnp.float32),
    }
    return params


if __name__ == "__main__":
    root = jax.random.PRNGKey(0)
    pkey, xkey = jax.random.split(root)
    params = init_simsiam_params(pkey)

    # Small MNIST-like input: NCHW, 1 channel (first conv is patched to 1 channel).
    # For best MXU utilization at scale, batch both SimSiam views together.
    x = jax.random.normal(xkey, (2, 1, 16, 16), dtype=jnp.float32)

    z, p = simsiam_forward(x, params)
    (z, p) = jax.block_until_ready((z, p))

    assert z.shape == (2, 2048) and p.shape == (2, 2048)
    assert z.dtype == jnp.float32 and p.dtype == jnp.float32
    assert bool(jnp.all(jnp.isfinite(z))) and bool(jnp.all(jnp.isfinite(p)))
    print("KERNEL_OK")
</pallas_src>

<mosaic_0001>
module attributes {stable_mosaic.version = 11 : i64} {
  func.func @_mm_stats_kernel_1k(%arg0: i32, %arg1: i32, %arg2: memref<512x9xbf16, #tpu.memory_space<vmem>>, %arg3: memref<9x64xbf16, #tpu.memory_space<vmem>>, %arg4: memref<512x64xbf16, #tpu.memory_space<vmem>>, %arg5: memref<1x1x64xf32, #tpu.memory_space<vmem>>, %arg6: memref<1x1x64xf32, #tpu.memory_space<vmem>>) attributes {dimension_semantics = [#tpu.dimension_semantics<parallel>, #tpu.dimension_semantics<parallel>], iteration_bounds = array<i64: 1, 1>, scalar_prefetch = 0 : i64, scratch_operands = 0 : i64, tpu.core_type = #tpu.core_type<tc>, window_params = [{transform_indices = @transform_0, window_bounds = array<i64: 512, 9>}, {transform_indices = @transform_1, window_bounds = array<i64: 9, 64>}, {transform_indices = @transform_2, window_bounds = array<i64: 512, 64>}, {transform_indices = @transform_3, window_bounds = array<i64: 1, 1, 64>}, {transform_indices = @transform_4, window_bounds = array<i64: 1, 1, 64>}]} {
    %c0 = arith.constant 0 : index
    %c0_0 = arith.constant 0 : index
    %0 = vector.load %arg2[%c0, %c0_0] : memref<512x9xbf16, #tpu.memory_space<vmem>>, vector<512x9xbf16>
    %c0_1 = arith.constant 0 : index
    %c0_2 = arith.constant 0 : index
    %1 = vector.load %arg3[%c0_1, %c0_2] : memref<9x64xbf16, #tpu.memory_space<vmem>>, vector<9x64xbf16>
    %cst = arith.constant dense<0.000000e+00> : vector<512x64xf32>
    %2 = tpu.matmul %0, %1, %cst {dimension_numbers = #tpu.dot_dimension_numbers<[1], [0], [0], [1], [0, 0, 1, 1], [], []>} : vector<512x9xbf16>, vector<9x64xbf16>, vector<512x64xf32> -> vector<512x64xf32>
    %cst_3 = arith.constant dense<0.000000e+00> : vector<64xf32>
    %3 = vector.multi_reduction <add>, %2, %cst_3 [0] : vector<512x64xf32> to vector<64xf32>
    %4 = vector.shape_cast %3 : vector<64xf32> to vector<1x64xf32>
    %c0_4 = arith.constant 0 : index
    %c0_5 = arith.constant 0 : index
    %c0_6 = arith.constant 0 : index
    %5 = vector.load %arg5[%c0_4, %c0_5, %c0_6] : memref<1x1x64xf32, #tpu.memory_space<vmem>>, vector<1x1x64xf32>
    %6 = vector.shape_cast %5 : vector<1x1x64xf32> to vector<1x64xf32>
    %7 = vector.shape_cast %4 : vector<1x64xf32> to vector<1x1x64xf32>
    tpu.vector_store %arg5[%c0_4, %c0_5, %c0_6], %7 {strides = array<i32>} : memref<1x1x64xf32, #tpu.memory_space<vmem>>, vector<1x1x64xf32>,
    %8 = arith.mulf %2, %2 : vector<512x64xf32>
    %cst_7 = arith.constant dense<0.000000e+00> : vector<64xf32>
    %9 = vector.multi_reduction <add>, %8, %cst_7 [0] : vector<512x64xf32> to vector<64xf32>
    %10 = vector.shape_cast %9 : vector<64xf32> to vector<1x64xf32>
    %c0_8 = arith.constant 0 : index
    %c0_9 = arith.constant 0 : index
    %c0_10 = arith.constant 0 : index
    %11 = vector.load %arg6[%c0_8, %c0_9, %c0_10] : memref<1x1x64xf32, #tpu.memory_space<vmem>>, vector<1x1x64xf32>
    %12 = vector.shape_cast %11 : vector<1x1x64xf32> to vector<1x64xf32>
    %13 = vector.shape_cast %10 : vector<1x64xf32> to vector<1x1x64xf32>
    tpu.vector_store %arg6[%c0_8, %c0_9, %c0_10], %13 {strides = array<i32>} : memref<1x1x64xf32, #tpu.memory_space<vmem>>, vector<1x1x64xf32>,
    %14 = arith.truncf %2 : vector<512x64xf32> to vector<512x64xbf16>
    %c0_11 = arith.constant 0 : index
    %c0_12 = arith.constant 0 : index
    %15 = vector.load %arg4[%c0_11, %c0_12] : memref<512x64xbf16, #tpu.memory_space<vmem>>, vector<512x64xbf16>
    tpu.vector_store %arg4[%c0_11, %c0_12], %14 {strides = array<i32>} : memref<512x64xbf16, #tpu.memory_space<vmem>>, vector<512x64xbf16>,
    return
  }
  func.func @transform_0(%arg0: i32, %arg1: i32) -> (i32, i32) {
    %c0_i32 = arith.constant 0 : i32
    %c0_i32_0 = arith.constant 0 : i32
    return %arg0, %c0_i32 : i32, i32
  }
  func.func @transform_1(%arg0: i32, %arg1: i32) -> (i32, i32) {
    %c0_i32 = arith.constant 0 : i32
    %c0_i32_0 = arith.constant 0 : i32
    return %c0_i32, %arg1 : i32, i32
  }
  func.func @transform_2(%arg0: i32, %arg1: i32) -> (i32, i32) {
    %c0_i32 = arith.constant 0 : i32
    return %arg0, %arg1 : i32, i32
  }
  func.func @transform_3(%arg0: i32, %arg1: i32) -> (i32, i32, i32) {
    %c0_i32 = arith.constant 0 : i32
    %c0_i32_0 = arith.constant 0 : i32
    return %arg0, %c0_i32, %arg1 : i32, i32, i32
  }
  func.func @transform_4(%arg0: i32, %arg1: i32) -> (i32, i32, i32) {
    %c0_i32 = arith.constant 0 : i32
    %c0_i32_0 = arith.constant 0 : i32
    return %arg0, %c0_i32, %arg1 : i32, i32, i32
  }
}

</mosaic_0001>

<bundles_post_ra>
// kernel: tpu_custom_call.1
= control target key start
LH: loop header
LB: loop body
LE: loop exit
PB: predicated region body
PF: predicated region fallthrough
CT: control target
= control target key end

     0   :  { %10 = vsyncpa [#allocation3], 0  ;;  %vm345_vm0 = vcmask 1043456   ;;  %vm346_vm1 = vcmask 1044480   ;;  %v1706_v2 = vmov 65535   ;;  %vm248_vm2 = vcmask 72704   ;;  %s2507_s0 = inlined_call_operand.vmem [shape: bf16[512,9], index: 0, kind: input, shape index: {}]   ;;  %s2508_s1 = inlined_call_operand.vmem [shape: bf16[9,64], index: 1, kind: input, shape index: {}]   ;;  %s2509_s2 = inlined_call_operand.vmem [shape: bf16[512,64], index: 2, kind: output, shape index: {0}]   ;;  %s2510_s3 = inlined_call_operand.hbm [shape: f32[1,1,64], index: 3, kind: output, shape index: {1}]   ;;  %s2511_s4 = inlined_call_operand.hbm [shape: f32[1,1,64], index: 4, kind: output, shape index: {2}]  }
   0x1   :  { %v1625_v0 = vld [vmem:[%s2508_s1] sm:$0x1f]   ;;  %v347_v3 = vsel %vm345_vm0, 4294967295, %v1706_v2  ;;  %v1627_v6 = vld [vmem:[%s2507_s0 + $0x8] sm:$0xff]   ;;  %v1628_v7 = vld [vmem:[%s2507_s0 + $0x10] sm:$0xff]  }
   0x2   :  { %v1626_v1 = vld [vmem:[%s2507_s0] sm:$0xff]   ;;  %v348_v4 = vsel %vm346_vm1, %v347_v3, 0  ;;  %v1629_v8 = vld [vmem:[%s2507_s0 + $0x18] sm:$0xff]   ;;  %v1643_v11 = vld [vmem:[%s2507_s0 + $0x88] sm:$0xff]  }
   0x3   :  { %1556 = vmatprep.mubr.msk.bf16.mxu0 %vm248_vm2, %v1626_v1  ;;  %v350_v5 = vand.u32 %v1625_v0, %v348_v4  ;;  %v1630_v9 = vld [vmem:[%s2507_s0 + $0x20] sm:$0xff]   ;;  %v1644_v12 = vld [vmem:[%s2507_s0 + $0x90] sm:$0xff]   ;;  %v1631_v13 = vld [vmem:[%s2507_s0 + $0x28] sm:$0xff]  }
   0x4   :  { %v1642_v10 = vld [vmem:[%s2507_s0 + $0x80] sm:$0xff]   ;;  %v1632_v14 = vld [vmem:[%s2507_s0 + $0x30] sm:$0xff]   ;;  %v1645_v15 = vld [vmem:[%s2507_s0 + $0x98] sm:$0xff]  }
   0x5   :  { %1554 = vmatprep.subr.bf16.mxu0 %v350_v5  ;;  %1620 = vmatprep.subr.bf16.mxu1 %v350_v5  ;;  %v1646_v16 = vld [vmem:[%s2507_s0 + $0xa0] sm:$0xff]   ;;  %v1633_v17 = vld [vmem:[%s2507_s0 + $0x38] sm:$0xff]   ;;  %v1647_v19 = vld [vmem:[%s2507_s0 + $0xa8] sm:$0xff]  }
   0x6   :  { %1555 = vmatpush3.bf16.msra.mxu0 %v350_v5  ;;  %1621 = vmatpush3.bf16.msra.mxu1 %v350_v5  ;;  %v1634_v18 = vld [vmem:[%s2507_s0 + $0x40] sm:$0xff]  }
   0x7   :  { %1588 = vmatprep.mubr.msk.bf16.mxu1 %vm248_vm2, %v1642_v10 }
   0x9   :  { %1557 = vmatmul.mubr.msk.bf16.vlgmr.msra.gmra.mrb[0].mxu0 %vm248_vm2, %v1627_v6  ;;  %1589 = vmatmul.mubr.msk.bf16.vlgmr.msra.gmra.mrb[0].mxu1 %vm248_vm2, %v1643_v11 }
   0xa   :  { %1560 = vmatprep.mubr.msk.bf16.mxu0 %vm248_vm2, %v1628_v7  ;;  %1592 = vmatprep.mubr.msk.bf16.mxu1 %vm248_vm2, %v1644_v12 }
  0x11   :  { %1561 = vmatmul.mubr.msk.bf16.gmra.mrb[4].mxu0 %vm248_vm2, %v1629_v8  ;;  %1593 = vmatmul.mubr.msk.bf16.gmra.mrb[4].mxu1 %vm248_vm2, %v1645_v15 }
  0x12   :  { %1564 = vmatprep.mubr.msk.bf16.mxu0 %vm248_vm2, %v1630_v9  ;;  %1596 = vmatprep.mubr.msk.bf16.mxu1 %vm248_vm2, %v1646_v16 }
  0x19   :  { %1565 = vmatmul.mubr.msk.bf16.gmra.mrb[8].mxu0 %vm248_vm2, %v1631_v13 }
  0x1a   :  { %1568 = vmatprep.mubr.msk.bf16.mxu0 %vm248_vm2, %v1632_v14 }
  0x1b   :  { %11 = vsyncpa [#allocation5], 0  ;;  %v1648_v20 = vld [vmem:[%s2507_s0 + $0xb0] sm:$0xff]   ;;  %1597 = vmatmul.mubr.msk.bf16.gmra.mrb[8].mxu1 %vm248_vm2, %v1647_v19  ;;  %v1635_v21 = vld [vmem:[%s2507_s0 + $0x48] sm:$0xff]   ;;  %vm1231_vm3 = vcmask 519168   ;;  %vm641_vm4 = vcmask 523264  }
  0x1c   :  { %1600 = vmatprep.mubr.msk.bf16.mxu1 %vm248_vm2, %v1648_v20  ;;  %v1636_v22 = vld [vmem:[%s2507_s0 + $0x50] sm:$0xff]   ;;  %v1649_v23 = vld [vmem:[%s2507_s0 + $0xb8] sm:$0xff]   ;;  %v1650_v24 = vld [vmem:[%s2507_s0 + $0xc0] sm:$0xff]   ;;  %vm775_vm5 = vcmask 516096   ;;  %s1708_s16 = smov [#allocation4]  }
  0x1d   :  { %v1637_v25 = vld [vmem:[%s2507_s0 + $0x58] sm:$0xff]   ;;  %v1638_v26 = vld [vmem:[%s2507_s0 + $0x60] sm:$0xff]   ;;  %v1651_v27 = vld [vmem:[%s2507_s0 + $0xc8] sm:$0xff]   ;;  %s1314_s17 = sshll.u32 %s1708_s16, 4  ;;  %s2474_s17 = int_to_ptr.vmem [resolvable:$true] %s1314_s17 }
  0x1e   :  { %v1652_v28 = vld [vmem:[%s2507_s0 + $0xd0] sm:$0xff]   ;;  %v1639_v29 = vld [vmem:[%s2507_s0 + $0x68] sm:$0xff]   ;;  %v1653_v31 = vld [vmem:[%s2507_s0 + $0xd8] sm:$0xff]  }
  0x1f   :  { %v1640_v30 = vld [vmem:[%s2507_s0 + $0x70] sm:$0xff]   ;;  %v1654_v32 = vld [vmem:[%s2507_s0 + $0xe0] sm:$0xff]   ;;  %v1641_v33 = vld [vmem:[%s2507_s0 + $0x78] sm:$0xff]  }
  0x20   :  { %v1655_v34 = vld [vmem:[%s2507_s0 + $0xe8] sm:$0xff]   ;;  %v1656_v35 = vld [vmem:[%s2507_s0 + $0xf0] sm:$0xff]   ;;  %v1657_v36 = vld [vmem:[%s2507_s0 + $0xf8] sm:$0xff]  }
  0x21   :  { %1569 = vmatmul.mubr.msk.bf16.gmra.mrb[12].mxu0 %vm248_vm2, %v1633_v17 }
  0x22   :  { %1572 = vmatprep.mubr.msk.bf16.mxu0 %vm248_vm2, %v1634_v18 }
  0x23   :  { %1601 = vmatmul.mubr.msk.bf16.gmra.mrb[12].mxu1 %vm248_vm2, %v1649_v23 }
  0x24   :  { %1604 = vmatprep.mubr.msk.bf16.mxu1 %vm248_vm2, %v1650_v24 }
  0x29   :  { %1573 = vmatmul.mubr.msk.bf16.gmra.mrb[16].mxu0 %vm248_vm2, %v1635_v21 }
  0x2a   :  { %1576 = vmatprep.mubr.msk.bf16.mxu0 %vm248_vm2, %v1636_v22 }
  0x2b   :  { %1605 = vmatmul.mubr.msk.bf16.gmra.mrb[16].mxu1 %vm248_vm2, %v1651_v27 }
  0x2c   :  { %1608 = vmatprep.mubr.msk.bf16.mxu1 %vm248_vm2, %v1652_v28 }
  0x31   :  { %1577 = vmatmul.mubr.msk.bf16.gmra.mrb[20].mxu0 %vm248_vm2, %v1637_v25 }
  0x32   :  { %1580 = vmatprep.mubr.msk.bf16.mxu0 %vm248_vm2, %v1638_v26 }
  0x33   :  { %1609 = vmatmul.mubr.msk.bf16.gmra.mrb[20].mxu1 %vm248_vm2, %v1653_v31 }
  0x34   :  { %1612 = vmatprep.mubr.msk.bf16.mxu1 %vm248_vm2, %v1654_v32 }
  0x39   :  { %1581 = vmatmul.mubr.msk.bf16.gmra.mrb[24].mxu0 %vm248_vm2, %v1639_v29 }
  0x3a   :  { %1584 = vmatprep.mubr.msk.bf16.mxu0 %vm248_vm2, %v1640_v30 }
  0x3b   :  { %1613 = vmatmul.mubr.msk.bf16.gmra.mrb[24].mxu1 %vm248_vm2, %v1655_v34 }
  0x3c   :  { %1616 = vmatprep.mubr.msk.bf16.mxu1 %vm248_vm2, %v1656_v35 }
  0x41   :  { %1585 = vmatmul.mubr.msk.bf16.gmra.mrb[28].mxu0 %vm248_vm2, %v1641_v33 }
  0x43   :  { %1617 = vmatmul.mubr.msk.bf16.gmra.mrb[28].mxu1 %vm248_vm2, %v1657_v36 }
  0xdc   :  { %v1558_v37 = vpop.f32.mrb[0].mxu0  ;;  %v1894_v7 = vpop.f32.mrb[0].mxu1 }
  0xdd   :  { %v1459_v38 = vpack.c.bf16 %v1558_v37, %v1558_v37  ;;  %v386_v39 = vpop.f32.mrb[1].mxu0  ;;  %v779_v43 = vmul.f32 %v1558_v37, %v1558_v37  ;;  %v645_v52 = vsel %vm641_vm4, %v1558_v37, 0.0  ;;  %v1902_v12 = vpop.f32.mrb[1].mxu1  ;;  %v1491_v19 = vpack.c.bf16 %v1894_v7, %v1894_v7 }
  0xde   :  { %v777_v40 = vmul.f32 %v386_v39, %v386_v39  ;;  %v1457_v41 = vpack.c.bf16 %v386_v39, %v386_v39  ;;  %v1559_v42 = vpop.f32.mrb[2].mxu0  ;;  %v642_v46 = vsel %vm641_vm4, %v386_v39, 0.0  ;;  %v1904_v17 = vpop.f32.mrb[2].mxu1  ;;  %v1489_v24 = vpack.c.bf16 %v1902_v12, %v1902_v12 }
  0xdf   :  { %1234 = vst.msk [vmem:[%s2509_s2 + $0x8] sm:$0xf] %vm1231_vm3, %v1459_v38  ;;  %v1460_v44 = vpack.c.bf16 %v1559_v42, %v1559_v42  ;;  %v389_v45 = vpop.f32.mrb[3].mxu0  ;;  %v780_v50 = vmul.f32 %v1559_v42, %v1559_v42  ;;  %v844_v57 = vsel %vm641_vm4, %v779_v43, 0.0  ;;  %v647_v59 = vsel %vm641_vm4, %v1559_v42, 0.0  ;;  %v1912_v20 = vpop.f32.mrb[3].mxu1 }
  0xe0   :  { %1232 = vst.msk [vmem:[%s2509_s2] sm:$0xf] %vm1231_vm3, %v1457_v41  ;;  %v643_v47 = vsel %vm641_vm4, %v389_v45, 0.0  ;;  %v778_v48 = vmul.f32 %v389_v45, %v389_v45  ;;  %v1458_v49 = vpack.c.bf16 %v389_v45, %v389_v45  ;;  %v841_v53 = vsel %vm641_vm4, %v777_v40, 0.0  ;;  %1266 = vst.msk [vmem:[%s2509_s2 + $0x88] sm:$0xf] %vm1231_vm3, %v1491_v19 }
  0xe1   :  { %1235 = vst.msk [vmem:[%s2509_s2 + $0xc] sm:$0xf] %vm1231_vm3, %v1460_v44  ;;  %v644_v51 = vadd.f32 %v643_v47, %v642_v46  ;;  %v846_v60 = vsel %vm641_vm4, %v780_v50, 0.0  ;;  %1264 = vst.msk [vmem:[%s2509_s2 + $0x80] sm:$0xf] %vm1231_vm3, %v1489_v24 }
  0xe2   :  { %v842_v54 = vsel %vm641_vm4, %v778_v48, 0.0  ;;  %1233 = vst.msk [vmem:[%s2509_s2 + $0x4] sm:$0xf] %vm1231_vm3, %v1458_v49 }
  0xe3   :  { %v646_v55 = vadd.f32 %v645_v52, %v644_v51  ;;  %v843_v56 = vadd.f32 %v842_v54, %v841_v53  ;;  %v1492_v53 = vpack.c.bf16 %v1904_v17, %v1904_v17 }
  0xe4   :  { %v1562_v58 = vpop.f32.mrb[4].mxu0  ;;  %v1938_v40 = vpop.f32.mrb[4].mxu1 }
  0xe5   :  { %v845_v61 = vadd.f32 %v844_v57, %v843_v56  ;;  %v1463_v62 = vpack.c.bf16 %v1562_v58, %v1562_v58  ;;  %v402_v63 = vpop.f32.mrb[5].mxu0  ;;  %v648_v0 = vadd.f32 %v647_v59, %v646_v55  ;;  %v783_v13 = vmul.f32 %v1562_v58, %v1562_v58  ;;  %v1941_v45 = vpop.f32.mrb[5].mxu1  ;;  %1267 = vst.msk [vmem:[%s2509_s2 + $0x8c] sm:$0xf] %vm1231_vm3, %v1492_v53 }
  0xe6   :  { %v649_v1 = vsel %vm641_vm4, %v402_v63, 0.0  ;;  %v781_v2 = vmul.f32 %v402_v63, %v402_v63  ;;  %v1461_v3 = vpack.c.bf16 %v402_v63, %v402_v63  ;;  %v1563_v4 = vpop.f32.mrb[6].mxu0  ;;  %v653_v21 = vsel %vm641_vm4, %v1562_v58, 0.0  ;;  %v1948_v50 = vpop.f32.mrb[6].mxu1 }
  0xe7   :  { %1238 = vst.msk [vmem:[%s2509_s2 + $0x18] sm:$0xf] %vm1231_vm3, %v1463_v62  ;;  %v847_v5 = vadd.f32 %v846_v60, %v845_v61  ;;  %v405_v6 = vpop.f32.mrb[7].mxu0  ;;  %v650_v8 = vadd.f32 %v649_v1, %v648_v0  ;;  %v1464_v10 = vpack.c.bf16 %v1563_v4, %v1563_v4  ;;  %v784_v22 = vmul.f32 %v1563_v4, %v1563_v4  ;;  %v1956_v54 = vpop.f32.mrb[7].mxu1 }
  0xe8   :  { %v848_v9 = vsel %vm641_vm4, %v781_v2, 0.0  ;;  %1236 = vst.msk [vmem:[%s2509_s2 + $0x10] sm:$0xf] %vm1231_vm3, %v1461_v3  ;;  %v651_v11 = vsel %vm641_vm4, %v405_v6, 0.0  ;;  %v782_v15 = vmul.f32 %v405_v6, %v405_v6  ;;  %v1462_v16 = vpack.c.bf16 %v405_v6, %v405_v6 }
  0xe9   :  { %v849_v14 = vadd.f32 %v848_v9, %v847_v5  ;;  %1239 = vst.msk [vmem:[%s2509_s2 + $0x1c] sm:$0xf] %vm1231_vm3, %v1464_v10  ;;  %v652_v18 = vadd.f32 %v651_v11, %v650_v8  ;;  %v852_v28 = vsel %vm641_vm4, %v783_v13, 0.0  ;;  %v655_v29 = vsel %vm641_vm4, %v1563_v4, 0.0 }
  0xea   :  { %v850_v23 = vsel %vm641_vm4, %v782_v15, 0.0  ;;  %1237 = vst.msk [vmem:[%s2509_s2 + $0x14] sm:$0xf] %vm1231_vm3, %v1462_v16  ;;  %v854_v37 = vsel %vm641_vm4, %v784_v22, 0.0  ;;  %v1490_v58 = vpack.c.bf16 %v1912_v20, %v1912_v20 }
  0xeb   :  { %v654_v25 = vadd.f32 %v653_v21, %v652_v18  ;;  %v851_v26 = vadd.f32 %v850_v23, %v849_v14 }
  0xec   :  { %v1566_v27 = vpop.f32.mrb[8].mxu0  ;;  %1265 = vst.msk [vmem:[%s2509_s2 + $0x84] sm:$0xf] %vm1231_vm3, %v1490_v58 }
  0xed   :  { %v1467_v30 = vpack.c.bf16 %v1566_v27, %v1566_v27  ;;  %v418_v31 = vpop.f32.mrb[9].mxu0  ;;  %v853_v32 = vadd.f32 %v852_v28, %v851_v26  ;;  %v656_v33 = vadd.f32 %v655_v29, %v654_v25  ;;  %v787_v46 = vmul.f32 %v1566_v27, %v1566_v27 }
  0xee   :  { %v657_v34 = vsel %vm641_vm4, %v418_v31, 0.0  ;;  %v785_v35 = vmul.f32 %v418_v31, %v418_v31  ;;  %v1567_v36 = vpop.f32.mrb[10].mxu0  ;;  %v1465_v38 = vpack.c.bf16 %v418_v31, %v418_v31  ;;  %v661_v55 = vsel %vm641_vm4, %v1566_v27, 0.0  ;;  %v1982_v11 = vpop.f32.mrb[8].mxu1 }
  0xef   :  { %1242 = vst.msk [vmem:[%s2509_s2 + $0x28] sm:$0xf] %vm1231_vm3, %v1467_v30  ;;  %v421_v39 = vpop.f32.mrb[11].mxu0  ;;  %v658_v41 = vadd.f32 %v657_v34, %v656_v33  ;;  %v855_v42 = vadd.f32 %v854_v37, %v853_v32  ;;  %v1468_v44 = vpack.c.bf16 %v1567_v36, %v1567_v36  ;;  %v788_v56 = vmul.f32 %v1567_v36, %v1567_v36  ;;  %v1985_v18 = vpop.f32.mrb[9].mxu1 }
  0xf0   :  { %v856_v43 = vsel %vm641_vm4, %v785_v35, 0.0  ;;  %1240 = vst.msk [vmem:[%s2509_s2 + $0x20] sm:$0xf] %vm1231_vm3, %v1465_v38  ;;  %v659_v47 = vsel %vm641_vm4, %v421_v39, 0.0  ;;  %v786_v48 = vmul.f32 %v421_v39, %v421_v39  ;;  %v1466_v49 = vpack.c.bf16 %v421_v39, %v421_v39  ;;  %v1992_v24 = vpop.f32.mrb[10].mxu1 }
  0xf1   :  { %v857_v51 = vadd.f32 %v856_v43, %v855_v42  ;;  %1243 = vst.msk [vmem:[%s2509_s2 + $0x2c] sm:$0xf] %vm1231_vm3, %v1468_v44  ;;  %v660_v52 = vadd.f32 %v659_v47, %v658_v41  ;;  %v860_v62 = vsel %vm641_vm4, %v787_v46, 0.0  ;;  %v663_v63 = vsel %vm641_vm4, %v1567_v36, 0.0  ;;  %v2000_v28 = vpop.f32.mrb[11].mxu1 }
  0xf2   :  { %v858_v57 = vsel %vm641_vm4, %v786_v48, 0.0  ;;  %1241 = vst.msk [vmem:[%s2509_s2 + $0x24] sm:$0xf] %vm1231_vm3, %v1466_v49  ;;  %v862_v8 = vsel %vm641_vm4, %v788_v56, 0.0  ;;  %v1495_v27 = vpack.c.bf16 %v1938_v40, %v1938_v40  ;;  %v1493_v32 = vpack.c.bf16 %v1941_v45, %v1941_v45 }
  0xf3   :  { %v662_v59 = vadd.f32 %v661_v55, %v660_v52  ;;  %v859_v60 = vadd.f32 %v858_v57, %v857_v51 }
  0xf4   :  { %v1570_v61 = vpop.f32.mrb[12].mxu0  ;;  %1270 = vst.msk [vmem:[%s2509_s2 + $0x98] sm:$0xf] %vm1231_vm3, %v1495_v27  ;;  %1268 = vst.msk [vmem:[%s2509_s2 + $0x90] sm:$0xf] %vm1231_vm3, %v1493_v32 }
  0xf5   :  { %v1471_v0 = vpack.c.bf16 %v1570_v61, %v1570_v61  ;;  %v434_v1 = vpop.f32.mrb[13].mxu0  ;;  %v861_v2 = vadd.f32 %v860_v62, %v859_v60  ;;  %v664_v3 = vadd.f32 %v663_v63, %v662_v59  ;;  %v791_v19 = vmul.f32 %v1570_v61, %v1570_v61 }
  0xf6   :  { %v665_v4 = vsel %vm641_vm4, %v434_v1, 0.0  ;;  %v789_v5 = vmul.f32 %v434_v1, %v434_v1  ;;  %v1571_v6 = vpop.f32.mrb[14].mxu0  ;;  %v1469_v9 = vpack.c.bf16 %v434_v1, %v434_v1  ;;  %v669_v29 = vsel %vm641_vm4, %v1570_v61, 0.0  ;;  %v2026_v51 = vpop.f32.mrb[12].mxu1 }
  0xf7   :  { %1246 = vst.msk [vmem:[%s2509_s2 + $0x38] sm:$0xf] %vm1231_vm3, %v1471_v0  ;;  %v437_v10 = vpop.f32.mrb[15].mxu0  ;;  %v666_v13 = vadd.f32 %v665_v4, %v664_v3  ;;  %v863_v14 = vadd.f32 %v862_v8, %v861_v2  ;;  %v1472_v16 = vpack.c.bf16 %v1571_v6, %v1571_v6  ;;  %v792_v30 = vmul.f32 %v1571_v6, %v1571_v6  ;;  %v2029_v57 = vpop.f32.mrb[13].mxu1 }
  0xf8   :  { %v864_v15 = vsel %vm641_vm4, %v789_v5, 0.0  ;;  %1244 = vst.msk [vmem:[%s2509_s2 + $0x30] sm:$0xf] %vm1231_vm3, %v1469_v9  ;;  %v667_v21 = vsel %vm641_vm4, %v437_v10, 0.0  ;;  %v790_v22 = vmul.f32 %v437_v10, %v437_v10  ;;  %v1470_v23 = vpack.c.bf16 %v437_v10, %v437_v10  ;;  %v2036_v62 = vpop.f32.mrb[14].mxu1 }
  0xf9   :  { %v865_v25 = vadd.f32 %v864_v15, %v863_v14  ;;  %1247 = vst.msk [vmem:[%s2509_s2 + $0x3c] sm:$0xf] %vm1231_vm3, %v1472_v16  ;;  %v668_v26 = vadd.f32 %v667_v21, %v666_v13  ;;  %v868_v36 = vsel %vm641_vm4, %v791_v19, 0.0  ;;  %v671_v37 = vsel %vm641_vm4, %v1571_v6, 0.0  ;;  %v2044_v2 = vpop.f32.mrb[15].mxu1 }
  0xfa   :  { %v866_v31 = vsel %vm641_vm4, %v790_v22, 0.0  ;;  %1245 = vst.msk [vmem:[%s2509_s2 + $0x34] sm:$0xf] %vm1231_vm3, %v1470_v23  ;;  %v870_v47 = vsel %vm641_vm4, %v792_v30, 0.0  ;;  %v1496_v1 = vpack.c.bf16 %v1948_v50, %v1948_v50  ;;  %v1494_v6 = vpack.c.bf16 %v1956_v54, %v1956_v54 }
  0xfb   :  { %v670_v33 = vadd.f32 %v669_v29, %v668_v26  ;;  %v867_v34 = vadd.f32 %v866_v31, %v865_v25 }
  0xfc   :  { %v1574_v35 = vpop.f32.mrb[16].mxu0  ;;  %1271 = vst.msk [vmem:[%s2509_s2 + $0x9c] sm:$0xf] %vm1231_vm3, %v1496_v1  ;;  %1269 = vst.msk [vmem:[%s2509_s2 + $0x94] sm:$0xf] %vm1231_vm3, %v1494_v6 }
  0xfd   :  { %v1475_v38 = vpack.c.bf16 %v1574_v35, %v1574_v35  ;;  %v450_v39 = vpop.f32.mrb[17].mxu0  ;;  %v869_v41 = vadd.f32 %v868_v36, %v867_v34  ;;  %v672_v42 = vadd.f32 %v671_v37, %v670_v33  ;;  %v795_v58 = vmul.f32 %v1574_v35, %v1574_v35 }
  0xfe   :  { %v673_v43 = vsel %vm641_vm4, %v450_v39, 0.0  ;;  %v793_v44 = vmul.f32 %v450_v39, %v450_v39  ;;  %v1575_v46 = vpop.f32.mrb[18].mxu0  ;;  %v1473_v48 = vpack.c.bf16 %v450_v39, %v450_v39  ;;  %v677_v3 = vsel %vm641_vm4, %v1574_v35, 0.0  ;;  %v2070_v30 = vpop.f32.mrb[16].mxu1 }
  0xff   :  { %1250 = vst.msk [vmem:[%s2509_s2 + $0x48] sm:$0xf] %vm1231_vm3, %v1475_v38  ;;  %v453_v49 = vpop.f32.mrb[19].mxu0  ;;  %v674_v52 = vadd.f32 %v673_v43, %v672_v42  ;;  %v871_v53 = vadd.f32 %v870_v47, %v869_v41  ;;  %v1476_v56 = vpack.c.bf16 %v1575_v46, %v1575_v46  ;;  %v796_v4 = vmul.f32 %v1575_v46, %v1575_v46  ;;  %v2073_v35 = vpop.f32.mrb[17].mxu1 }
 0x100   :  { %v872_v55 = vsel %vm641_vm4, %v793_v44, 0.0  ;;  %1248 = vst.msk [vmem:[%s2509_s2 + $0x40] sm:$0xf] %vm1231_vm3, %v1473_v48  ;;  %v675_v59 = vsel %vm641_vm4, %v453_v49, 0.0  ;;  %v794_v60 = vmul.f32 %v453_v49, %v453_v49  ;;  %v1474_v61 = vpack.c.bf16 %v453_v49, %v453_v49  ;;  %v2080_v41 = vpop.f32.mrb[18].mxu1 }
 0x101   :  { %v873_v63 = vadd.f32 %v872_v55, %v871_v53  ;;  %1251 = vst.msk [vmem:[%s2509_s2 + $0x4c] sm:$0xf] %vm1231_vm3, %v1476_v56  ;;  %v676_v0 = vadd.f32 %v675_v59, %v674_v52  ;;  %v876_v13 = vsel %vm641_vm4, %v795_v58, 0.0  ;;  %v679_v14 = vsel %vm641_vm4, %v1575_v46, 0.0  ;;  %v2088_v46 = vpop.f32.mrb[19].mxu1 }
 0x102   :  { %v874_v5 = vsel %vm641_vm4, %v794_v60, 0.0  ;;  %1249 = vst.msk [vmem:[%s2509_s2 + $0x44] sm:$0xf] %vm1231_vm3, %v1474_v61  ;;  %v878_v26 = vsel %vm641_vm4, %v796_v4, 0.0  ;;  %v1499_v44 = vpack.c.bf16 %v1982_v11, %v1982_v11  ;;  %v1497_v52 = vpack.c.bf16 %v1985_v18, %v1985_v18 }
 0x103   :  { %v678_v8 = vadd.f32 %v677_v3, %v676_v0  ;;  %v875_v9 = vadd.f32 %v874_v5, %v873_v63 }
 0x104   :  { %v1578_v10 = vpop.f32.mrb[20].mxu0  ;;  %1274 = vst.msk [vmem:[%s2509_s2 + $0xa8] sm:$0xf] %vm1231_vm3, %v1499_v44  ;;  %1272 = vst.msk [vmem:[%s2509_s2 + $0xa0] sm:$0xf] %vm1231_vm3, %v1497_v52 }
 0x105   :  { %v1479_v15 = vpack.c.bf16 %v1578_v10, %v1578_v10  ;;  %v466_v16 = vpop.f32.mrb[21].mxu0  ;;  %v877_v19 = vadd.f32 %v876_v13, %v875_v9  ;;  %v680_v21 = vadd.f32 %v679_v14, %v678_v8  ;;  %v799_v36 = vmul.f32 %v1578_v10, %v1578_v10 }
 0x106   :  { %v681_v22 = vsel %vm641_vm4, %v466_v16, 0.0  ;;  %v797_v23 = vmul.f32 %v466_v16, %v466_v16  ;;  %v1579_v25 = vpop.f32.mrb[22].mxu0  ;;  %v1477_v27 = vpack.c.bf16 %v466_v16, %v466_v16  ;;  %v685_v47 = vsel %vm641_vm4, %v1578_v10, 0.0  ;;  %v2114_v9 = vpop.f32.mrb[20].mxu1 }
 0x107   :  { %1254 = vst.msk [vmem:[%s2509_s2 + $0x58] sm:$0xf] %vm1231_vm3, %v1479_v15  ;;  %v469_v29 = vpop.f32.mrb[23].mxu0  ;;  %v682_v31 = vadd.f32 %v681_v22, %v680_v21  ;;  %v879_v32 = vadd.f32 %v878_v26, %v877_v19  ;;  %v1480_v34 = vpack.c.bf16 %v1579_v25, %v1579_v25  ;;  %v800_v48 = vmul.f32 %v1579_v25, %v1579_v25  ;;  %v2117_v16 = vpop.f32.mrb[21].mxu1 }
 0x108   :  { %v880_v33 = vsel %vm641_vm4, %v797_v23, 0.0  ;;  %1252 = vst.msk [vmem:[%s2509_s2 + $0x50] sm:$0xf] %vm1231_vm3, %v1477_v27  ;;  %v683_v37 = vsel %vm641_vm4, %v469_v29, 0.0  ;;  %v798_v38 = vmul.f32 %v469_v29, %v469_v29  ;;  %v1478_v39 = vpack.c.bf16 %v469_v29, %v469_v29 }
 0x109   :  { %v881_v42 = vadd.f32 %v880_v33, %v879_v32  ;;  %1255 = vst.msk [vmem:[%s2509_s2 + $0x5c] sm:$0xf] %vm1231_vm3, %v1480_v34  ;;  %v684_v43 = vadd.f32 %v683_v37, %v682_v31  ;;  %v884_v58 = vsel %vm641_vm4, %v799_v36, 0.0  ;;  %v687_v59 = vsel %vm641_vm4, %v1579_v25, 0.0  ;;  %v2124_v25 = vpop.f32.mrb[22].mxu1 }
 0x10a   :  { %v882_v49 = vsel %vm641_vm4, %v798_v38, 0.0  ;;  %1253 = vst.msk [vmem:[%s2509_s2 + $0x54] sm:$0xf] %vm1231_vm3, %v1478_v39  ;;  %v886_v5 = vsel %vm641_vm4, %v800_v48, 0.0  ;;  %v1500_v29 = vpack.c.bf16 %v1992_v24, %v1992_v24  ;;  %v2132_v31 = vpop.f32.mrb[23].mxu1  ;;  %v1498_v36 = vpack.c.bf16 %v2000_v28, %v2000_v28 }
 0x10b   :  { %v686_v53 = vadd.f32 %v685_v47, %v684_v43  ;;  %v883_v55 = vadd.f32 %v882_v49, %v881_v42 }
 0x10c   :  { %v1582_v56 = vpop.f32.mrb[24].mxu0  ;;  %1275 = vst.msk [vmem:[%s2509_s2 + $0xac] sm:$0xf] %vm1231_vm3, %v1500_v29  ;;  %1273 = vst.msk [vmem:[%s2509_s2 + $0xa4] sm:$0xf] %vm1231_vm3, %v1498_v36  ;;  %v705_v36 = vsel %vm641_vm4, %v1902_v12, 0.0 }
 0x10d   :  { %v1483_v60 = vpack.c.bf16 %v1582_v56, %v1582_v56  ;;  %v482_v61 = vpop.f32.mrb[25].mxu0  ;;  %v885_v63 = vadd.f32 %v884_v58, %v883_v55  ;;  %v688_v0 = vadd.f32 %v687_v59, %v686_v53  ;;  %v803_v19 = vmul.f32 %v1582_v56, %v1582_v56 }
 0x10e   :  { %v689_v1 = vsel %vm641_vm4, %v482_v61, 0.0  ;;  %v801_v3 = vmul.f32 %v482_v61, %v482_v61  ;;  %v1583_v4 = vpop.f32.mrb[26].mxu0  ;;  %v1481_v6 = vpack.c.bf16 %v482_v61, %v482_v61  ;;  %v693_v32 = vsel %vm641_vm4, %v1582_v56, 0.0 }
 0x10f   :  { %1258 = vst.msk [vmem:[%s2509_s2 + $0x68] sm:$0xf] %vm1231_vm3, %v1483_v60  ;;  %v485_v8 = vpop.f32.mrb[27].mxu0  ;;  %v690_v10 = vadd.f32 %v689_v1, %v688_v0  ;;  %v887_v13 = vadd.f32 %v886_v5, %v885_v63  ;;  %v1484_v15 = vpack.c.bf16 %v1583_v4, %v1583_v4  ;;  %v804_v33 = vmul.f32 %v1583_v4, %v1583_v4  ;;  %v2158_v60 = vpop.f32.mrb[24].mxu1 }
 0x110   :  { %v888_v14 = vsel %vm641_vm4, %v801_v3, 0.0  ;;  %1256 = vst.msk [vmem:[%s2509_s2 + $0x60] sm:$0xf] %vm1231_vm3, %v1481_v6  ;;  %v691_v21 = vsel %vm641_vm4, %v485_v8, 0.0  ;;  %v802_v22 = vmul.f32 %v485_v8, %v485_v8  ;;  %v1482_v23 = vpack.c.bf16 %v485_v8, %v485_v8  ;;  %v2161_v3 = vpop.f32.mrb[25].mxu1 }
 0x111   :  { %v889_v26 = vadd.f32 %v888_v14, %v887_v13  ;;  %1259 = vst.msk [vmem:[%s2509_s2 + $0x6c] sm:$0xf] %vm1231_vm3, %v1484_v15  ;;  %v692_v27 = vadd.f32 %v691_v21, %v690_v10  ;;  %v892_v42 = vsel %vm641_vm4, %v803_v19, 0.0  ;;  %v695_v43 = vsel %vm641_vm4, %v1583_v4, 0.0  ;;  %v2168_v10 = vpop.f32.mrb[26].mxu1 }
 0x112   :  { %v890_v34 = vsel %vm641_vm4, %v802_v22, 0.0  ;;  %1257 = vst.msk [vmem:[%s2509_s2 + $0x64] sm:$0xf] %vm1231_vm3, %v1482_v23  ;;  %v894_v56 = vsel %vm641_vm4, %v804_v33, 0.0  ;;  %v809_v15 = vmul.f32 %v1902_v12, %v1902_v12  ;;  %v1503_v19 = vpack.c.bf16 %v2026_v51, %v2026_v51  ;;  %v2178_v21 = vpop.f32.mrb[27].mxu1 }
 0x113   :  { %v694_v37 = vadd.f32 %v693_v32, %v692_v27  ;;  %v891_v38 = vadd.f32 %v890_v34, %v889_v26  ;;  %v1501_v27 = vpack.c.bf16 %v2029_v57, %v2029_v57  ;;  %v810_v12 = vmul.f32 %v1912_v20, %v1912_v20 }
 0x114   :  { %v1586_v39 = vpop.f32.mrb[28].mxu0  ;;  %1278 = vst.msk [vmem:[%s2509_s2 + $0xb8] sm:$0xf] %vm1231_vm3, %v1503_v19  ;;  %v713_v19 = vsel %vm641_vm4, %v1941_v45, 0.0 }
 0x115   :  { %v1487_v44 = vpack.c.bf16 %v1586_v39, %v1586_v39  ;;  %v498_v47 = vpop.f32.mrb[29].mxu0  ;;  %v893_v48 = vadd.f32 %v892_v42, %v891_v38  ;;  %v696_v49 = vadd.f32 %v695_v43, %v694_v37  ;;  %v807_v4 = vmul.f32 %v1586_v39, %v1586_v39  ;;  %1276 = vst.msk [vmem:[%s2509_s2 + $0xb0] sm:$0xf] %vm1231_vm3, %v1501_v27 }
 0x116   :  { %v697_v52 = vsel %vm641_vm4, %v498_v47, 0.0  ;;  %v805_v53 = vmul.f32 %v498_v47, %v498_v47  ;;  %v1587_v55 = vpop.f32.mrb[30].mxu0  ;;  %v1485_v58 = vpack.c.bf16 %v498_v47, %v498_v47  ;;  %v701_v22 = vsel %vm641_vm4, %v1586_v39, 0.0 }
 0x117   :  { %1262 = vst.msk [vmem:[%s2509_s2 + $0x78] sm:$0xf] %vm1231_vm3, %v1487_v44  ;;  %v501_v59 = vpop.f32.mrb[31].mxu0  ;;  %v698_v61 = vadd.f32 %v697_v52, %v696_v49  ;;  %v895_v63 = vadd.f32 %v894_v56, %v893_v48  ;;  %v1488_v1 = vpack.c.bf16 %v1587_v55, %v1587_v55  ;;  %v808_v23 = vmul.f32 %v1587_v55, %v1587_v55  ;;  %v2214_v48 = vpop.f32.mrb[28].mxu1 }
 0x118   :  { %v896_v0 = vsel %vm641_vm4, %v805_v53, 0.0  ;;  %1260 = vst.msk [vmem:[%s2509_s2 + $0x70] sm:$0xf] %vm1231_vm3, %v1485_v58  ;;  %v699_v5 = vsel %vm641_vm4, %v501_v59, 0.0  ;;  %v806_v6 = vmul.f32 %v501_v59, %v501_v59  ;;  %v1486_v8 = vpack.c.bf16 %v501_v59, %v501_v59  ;;  %v2220_v53 = vpop.f32.mrb[29].mxu1 }
 0x119   :  { %v897_v13 = vadd.f32 %v896_v0, %v895_v63  ;;  %1263 = vst.msk [vmem:[%s2509_s2 + $0x7c] sm:$0xf] %vm1231_vm3, %v1488_v1  ;;  %v700_v14 = vadd.f32 %v699_v5, %v698_v61  ;;  %v900_v33 = vsel %vm641_vm4, %v807_v4, 0.0  ;;  %v703_v34 = vsel %vm641_vm4, %v1587_v55, 0.0  ;;  %v2232_v59 = vpop.f32.mrb[30].mxu1 }
 0x11a   :  { %v898_v26 = vsel %vm641_vm4, %v806_v6, 0.0  ;;  %1261 = vst.msk [vmem:[%s2509_s2 + $0x74] sm:$0xf] %vm1231_vm3, %v1486_v8  ;;  %v1504_v37 = vpack.c.bf16 %v2036_v62, %v2036_v62  ;;  %v1502_v42 = vpack.c.bf16 %v2044_v2, %v2044_v2  ;;  %v902_v43 = vsel %vm641_vm4, %v808_v23, 0.0  ;;  %v2238_v4 = vpop.f32.mrb[31].mxu1 }
 0x11b   :  { %v702_v29 = vadd.f32 %v701_v22, %v700_v14  ;;  %v899_v32 = vadd.f32 %v898_v26, %v897_v13  ;;  %v904_v44 = vsel %vm641_vm4, %v809_v15, 0.0  ;;  %v1507_v47 = vpack.c.bf16 %v2070_v30, %v2070_v30 }
 0x11c   :  { %1279 = vst.msk [vmem:[%s2509_s2 + $0xbc] sm:$0xf] %vm1231_vm3, %v1504_v37  ;;  %1277 = vst.msk [vmem:[%s2509_s2 + $0xb4] sm:$0xf] %vm1231_vm3, %v1502_v42  ;;  %v811_v55 = vmul.f32 %v1894_v7, %v1894_v7  ;;  %v707_v56 = vsel %vm641_vm4, %v1912_v20, 0.0  ;;  %v1505_v58 = vpack.c.bf16 %v2073_v35, %v2073_v35  ;;  %v709_v61 = vsel %vm641_vm4, %v1894_v7, 0.0 }
 0x11d   :  { %v901_v38 = vadd.f32 %v900_v33, %v899_v32  ;;  %v704_v39 = vadd.f32 %v703_v34, %v702_v29  ;;  %1282 = vst.msk [vmem:[%s2509_s2 + $0xc8] sm:$0xf] %vm1231_vm3, %v1507_v47  ;;  %v1508_v1 = vpack.c.bf16 %v2080_v41, %v2080_v41  ;;  %v812_v20 = vmul.f32 %v1904_v17, %v1904_v17 }
 0x11e   :  { %v906_v5 = vsel %vm641_vm4, %v810_v12, 0.0  ;;  %v813_v6 = vmul.f32 %v1941_v45, %v1941_v45  ;;  %1280 = vst.msk [vmem:[%s2509_s2 + $0xc0] sm:$0xf] %vm1231_vm3, %v1505_v58  ;;  %v1506_v7 = vpack.c.bf16 %v2088_v46, %v2088_v46  ;;  %v908_v14 = vsel %vm641_vm4, %v811_v55, 0.0 }
 0x11f   :  { %v706_v49 = vadd.f32 %v705_v36, %v704_v39  ;;  %v903_v52 = vadd.f32 %v902_v43, %v901_v38  ;;  %1283 = vst.msk [vmem:[%s2509_s2 + $0xcc] sm:$0xf] %vm1231_vm3, %v1508_v1  ;;  %v711_v15 = vsel %vm641_vm4, %v1904_v17, 0.0  ;;  %v1511_v22 = vpack.c.bf16 %v2114_v9, %v2114_v9 }
 0x120   :  { %1281 = vst.msk [vmem:[%s2509_s2 + $0xc4] sm:$0xf] %vm1231_vm3, %v1506_v7  ;;  %v1509_v27 = vpack.c.bf16 %v2117_v16, %v2117_v16  ;;  %v910_v29 = vsel %vm641_vm4, %v812_v20, 0.0  ;;  %v912_v17 = vsel %vm641_vm4, %v813_v6, 0.0  ;;  %v814_v45 = vmul.f32 %v1956_v54, %v1956_v54 }
 0x121   :  { %v905_v63 = vadd.f32 %v904_v44, %v903_v52  ;;  %v708_v0 = vadd.f32 %v707_v56, %v706_v49  ;;  %1286 = vst.msk [vmem:[%s2509_s2 + $0xd8] sm:$0xf] %vm1231_vm3, %v1511_v22  ;;  %v1512_v32 = vpack.c.bf16 %v2124_v25, %v2124_v25  ;;  %v815_v36 = vmul.f32 %v1938_v40, %v1938_v40 }
 0x122   :  { %1284 = vst.msk [vmem:[%s2509_s2 + $0xd0] sm:$0xf] %vm1231_vm3, %v1509_v27  ;;  %v715_v37 = vsel %vm641_vm4, %v1956_v54, 0.0  ;;  %v1510_v38 = vpack.c.bf16 %v2132_v31, %v2132_v31  ;;  %v717_v39 = vsel %vm641_vm4, %v1938_v40, 0.0  ;;  %v1515_v44 = vpack.c.bf16 %v2158_v60, %v2158_v60 }
 0x123   :  { %v710_v8 = vadd.f32 %v709_v61, %v708_v0  ;;  %v907_v13 = vadd.f32 %v906_v5, %v905_v63  ;;  %1287 = vst.msk [vmem:[%s2509_s2 + $0xdc] sm:$0xf] %vm1231_vm3, %v1512_v32  ;;  %v816_v12 = vmul.f32 %v1948_v50, %v1948_v50  ;;  %v914_v54 = vsel %vm641_vm4, %v814_v45, 0.0 }
 0x124   :  { %v817_v47 = vmul.f32 %v1985_v18, %v1985_v18  ;;  %1285 = vst.msk [vmem:[%s2509_s2 + $0xd4] sm:$0xf] %vm1231_vm3, %v1510_v38  ;;  %v1513_v40 = vpack.c.bf16 %v2161_v3, %v2161_v3  ;;  %1290 = vst.msk [vmem:[%s2509_s2 + $0xe8] sm:$0xf] %vm1231_vm3, %v1515_v44  ;;  %v916_v55 = vsel %vm641_vm4, %v815_v36, 0.0  ;;  %v719_v56 = vsel %vm641_vm4, %v1948_v50, 0.0 }
 0x125   :  { %v909_v23 = vadd.f32 %v908_v14, %v907_v13  ;;  %v712_v26 = vadd.f32 %v711_v15, %v710_v8  ;;  %v721_v58 = vsel %vm641_vm4, %v1985_v18, 0.0  ;;  %v1516_v61 = vpack.c.bf16 %v2168_v10, %v2168_v10 }
 0x126   :  { %1288 = vst.msk [vmem:[%s2509_s2 + $0xe0] sm:$0xf] %vm1231_vm3, %v1513_v40  ;;  %v1514_v1 = vpack.c.bf16 %v2178_v21, %v2178_v21  ;;  %v918_v20 = vsel %vm641_vm4, %v816_v12, 0.0  ;;  %v920_v50 = vsel %vm641_vm4, %v817_v47, 0.0  ;;  %v818_v18 = vmul.f32 %v2000_v28, %v2000_v28 }
 0x127   :  { %v714_v33 = vadd.f32 %v713_v19, %v712_v26  ;;  %v911_v34 = vadd.f32 %v910_v29, %v909_v23  ;;  %1291 = vst.msk [vmem:[%s2509_s2 + $0xec] sm:$0xf] %vm1231_vm3, %v1516_v61  ;;  %v1519_v5 = vpack.c.bf16 %v2214_v48, %v2214_v48  ;;  %v819_v8 = vmul.f32 %v1982_v11, %v1982_v11 }
 0x128   :  { %1289 = vst.msk [vmem:[%s2509_s2 + $0xe4] sm:$0xf] %vm1231_vm3, %v1514_v1  ;;  %v723_v13 = vsel %vm641_vm4, %v2000_v28, 0.0  ;;  %v1517_v14 = vpack.c.bf16 %v2220_v53, %v2220_v53  ;;  %v725_v15 = vsel %vm641_vm4, %v1982_v11, 0.0  ;;  %v1520_v23 = vpack.c.bf16 %v2232_v59, %v2232_v59 }
 0x129   :  { %v913_v42 = vadd.f32 %v912_v17, %v911_v34  ;;  %v716_v43 = vadd.f32 %v715_v37, %v714_v33  ;;  %1294 = vst.msk [vmem:[%s2509_s2 + $0xf8] sm:$0xf] %vm1231_vm3, %v1519_v5  ;;  %v820_v26 = vmul.f32 %v1992_v24, %v1992_v24  ;;  %v922_v28 = vsel %vm641_vm4, %v818_v18, 0.0 }
 0x12a   :  { %v821_v27 = vmul.f32 %v2029_v57, %v2029_v57  ;;  %1292 = vst.msk [vmem:[%s2509_s2 + $0xf0] sm:$0xf] %vm1231_vm3, %v1517_v14  ;;  %v1518_v11 = vpack.c.bf16 %v2238_v4, %v2238_v4  ;;  %1295 = vst.msk [vmem:[%s2509_s2 + $0xfc] sm:$0xf] %vm1231_vm3, %v1520_v23  ;;  %v924_v45 = vsel %vm641_vm4, %v819_v8, 0.0  ;;  %v727_v32 = vsel %vm641_vm4, %v1992_v24, 0.0 }
 0x12b   :  { %v718_v49 = vadd.f32 %v717_v39, %v716_v43  ;;  %v915_v52 = vadd.f32 %v914_v54, %v913_v42  ;;  %v729_v33 = vsel %vm641_vm4, %v2029_v57, 0.0  ;;  %v926_v37 = vsel %vm641_vm4, %v820_v26, 0.0 }
 0x12c   :  { %1293 = vst.msk [vmem:[%s2509_s2 + $0xf4] sm:$0xf] %vm1231_vm3, %v1518_v11  ;;  %v928_v38 = vsel %vm641_vm4, %v821_v27, 0.0  ;;  %v822_v39 = vmul.f32 %v2044_v2, %v2044_v2  ;;  %v823_v24 = vmul.f32 %v2026_v51, %v2026_v51  ;;  %v731_v57 = vsel %vm641_vm4, %v2044_v2, 0.0  ;;  %s1707_s2 = smov [#allocation2]  }
 0x12d   :  { %v917_v63 = vadd.f32 %v916_v55, %v915_v52  ;;  %v720_v0 = vadd.f32 %v719_v56, %v718_v49  ;;  %v733_v54 = vsel %vm641_vm4, %v2026_v51, 0.0  ;;  %v824_v47 = vmul.f32 %v2036_v62, %v2036_v62  ;;  %s1304_s15 = sshll.u32 %s1707_s2, 4  ;;  %s1305_s15 = int_to_ptr.vmem [resolvable:$true] %s1304_s15 }
 0x12e   :  { %v930_v40 = vsel %vm641_vm4, %v822_v39, 0.0  ;;  %v825_v49 = vmul.f32 %v2073_v35, %v2073_v35  ;;  %v932_v56 = vsel %vm641_vm4, %v823_v24, 0.0  ;;  %v735_v2 = vsel %vm641_vm4, %v2036_v62, 0.0  ;;  %s1658_s18 = scalar_lea.vmem %s1305_s15, 16  ;;  %s1662_s19 = scalar_lea.vmem %s1305_s15, 32 }
 0x12f   :  { %v722_v6 = vadd.f32 %v721_v58, %v720_v0  ;;  %v919_v7 = vadd.f32 %v918_v20, %v917_v63  ;;  %v737_v58 = vsel %vm641_vm4, %v2073_v35, 0.0  ;;  %v934_v63 = vsel %vm641_vm4, %v824_v47, 0.0  ;;  %p1659_p0 = scmp.ne.s32.totalorder %s1305_s15, %s1658_s18  ;;  %p1663_p1 = scmp.lt.s32.totalorder %s1305_s15, %s1305_s15 }
 0x130   :  { %v936_v0 = vsel %vm641_vm4, %v825_v49, 0.0  ;;  %v826_v1 = vmul.f32 %v2088_v46, %v2088_v46  ;;  %v827_v18 = vmul.f32 %v2070_v30, %v2070_v30  ;;  %v739_v62 = vsel %vm641_vm4, %v2088_v46, 0.0  ;;  %p1664_p2 = scmp.lt.s32.totalorder %s1662_s19, %s1658_s18 }
 0x131   :  { %v921_v19 = vadd.f32 %v920_v50, %v919_v7  ;;  %v724_v22 = vadd.f32 %v723_v13, %v722_v6  ;;  %v741_v35 = vsel %vm641_vm4, %v2070_v30, 0.0  ;;  %v828_v7 = vmul.f32 %v2080_v41, %v2080_v41 }
 0x132   :  { %v938_v8 = vsel %vm641_vm4, %v826_v1, 0.0  ;;  %v829_v13 = vmul.f32 %v2117_v16, %v2117_v16  ;;  %v743_v46 = vsel %vm641_vm4, %v2080_v41, 0.0  ;;  %v830_v27 = vmul.f32 %v2132_v31, %v2132_v31  ;;  %p1665_p3 = por %p1664_p2, %p1663_p1 }
 0x133   :  { %v726_v29 = vadd.f32 %v725_v15, %v724_v22  ;;  %v923_v17 = vadd.f32 %v922_v28, %v921_v19  ;;  %v940_v19 = vsel %vm641_vm4, %v827_v18, 0.0  ;;  %v745_v22 = vsel %vm641_vm4, %v2117_v16, 0.0 }
 0x134   :  { %v942_v26 = vsel %vm641_vm4, %v828_v7, 0.0  ;;  %v944_v28 = vsel %vm641_vm4, %v829_v13, 0.0  ;;  %v747_v41 = vsel %vm641_vm4, %v2132_v31, 0.0  ;;  %v749_v16 = vsel %vm641_vm4, %v2114_v9, 0.0  ;;  %p1666_p4 = pnand %p1665_p3, %p1659_p0 }
 0x135   :  { %v925_v34 = vadd.f32 %v924_v45, %v923_v17  ;;  %v728_v36 = vadd.f32 %v727_v32, %v726_v29  ;;  %v831_v17 = vmul.f32 %v2114_v9, %v2114_v9  ;;  %v751_v31 = vsel %vm641_vm4, %v2124_v25, 0.0 }
 0x136   :  { %v835_v47 = vmul.f32 %v2158_v60, %v2158_v60 }
 0x137   :  { %v730_v42 = vadd.f32 %v729_v33, %v728_v36  ;;  %v927_v43 = vadd.f32 %v926_v37, %v925_v34  ;;  %v832_v33 = vmul.f32 %v2124_v25, %v2124_v25  ;;  %v946_v34 = vsel %vm641_vm4, %v830_v27, 0.0 }
 0x138   :  { %v833_v36 = vmul.f32 %v2161_v3, %v2161_v3  ;;  %v948_v39 = vsel %vm641_vm4, %v831_v17, 0.0  ;;  %v755_v25 = vsel %vm641_vm4, %v2178_v21, 0.0 }
 0x139   :  { %v929_v44 = vadd.f32 %v928_v38, %v927_v43  ;;  %v732_v12 = vadd.f32 %v731_v57, %v730_v42  ;;  %v753_v42 = vsel %vm641_vm4, %v2161_v3, 0.0  ;;  %v950_v24 = vsel %vm641_vm4, %v832_v33, 0.0 }
 0x13a   :  { %v952_v57 = vsel %vm641_vm4, %v833_v36, 0.0  ;;  %v757_v3 = vsel %vm641_vm4, %v2158_v60, 0.0 }
 0x13b   :  { %v734_v52 = vadd.f32 %v733_v54, %v732_v12  ;;  %v931_v55 = vadd.f32 %v930_v40, %v929_v44  ;;  %v834_v44 = vmul.f32 %v2178_v21, %v2178_v21  ;;  %v759_v21 = vsel %vm641_vm4, %v2168_v10, 0.0 }
 0x13d   :  { %v933_v61 = vadd.f32 %v932_v56, %v931_v55  ;;  %v736_v51 = vadd.f32 %v735_v2, %v734_v52  ;;  %v836_v52 = vmul.f32 %v2168_v10, %v2168_v10  ;;  %v954_v55 = vsel %vm641_vm4, %v834_v44, 0.0 }
 0x13e   :  { %v837_v56 = vmul.f32 %v2220_v53, %v2220_v53  ;;  %v763_v10 = vsel %vm641_vm4, %v2238_v4, 0.0 }
 0x13f   :  { %v738_v20 = vadd.f32 %v737_v58, %v736_v51  ;;  %v935_v50 = vadd.f32 %v934_v63, %v933_v61  ;;  %v956_v61 = vsel %vm641_vm4, %v835_v47, 0.0  ;;  %v761_v51 = vsel %vm641_vm4, %v2220_v53, 0.0 }
 0x140   :  { %v960_v1 = vsel %vm641_vm4, %v837_v56, 0.0  ;;  %v765_v53 = vsel %vm641_vm4, %v2214_v48, 0.0 }
 0x141   :  { %v937_v5 = vadd.f32 %v936_v0, %v935_v50  ;;  %v740_v6 = vadd.f32 %v739_v62, %v738_v20  ;;  %v958_v0 = vsel %vm641_vm4, %v836_v52, 0.0  ;;  %v838_v20 = vmul.f32 %v2238_v4, %v2238_v4 }
 0x142   :  { %v839_v62 = vmul.f32 %v2214_v48, %v2214_v48 }
 0x143   :  { %v742_v14 = vadd.f32 %v741_v35, %v740_v6  ;;  %v939_v15 = vadd.f32 %v938_v8, %v937_v5  ;;  %v840_v35 = vmul.f32 %v2232_v59, %v2232_v59  ;;  %v962_v7 = vsel %vm641_vm4, %v838_v20, 0.0 }
 0x145   :  { %v941_v23 = vadd.f32 %v940_v19, %v939_v15  ;;  %v744_v30 = vadd.f32 %v743_v46, %v742_v14  ;;  %v964_v14 = vsel %vm641_vm4, %v839_v62, 0.0  ;;  %v767_v15 = vsel %vm641_vm4, %v2232_v59, 0.0 }
 0x146   :  { %v966_v4 = vsel %vm641_vm4, %v840_v35, 0.0 }
 0x147   :  { %v746_v11 = vadd.f32 %v745_v22, %v744_v30  ;;  %v943_v29 = vadd.f32 %v942_v26, %v941_v23 }
 0x149   :  { %v945_v45 = vadd.f32 %v944_v28, %v943_v29  ;;  %v748_v32 = vadd.f32 %v747_v41, %v746_v11 }
 0x14b   :  { %v750_v37 = vadd.f32 %v749_v16, %v748_v32  ;;  %v947_v38 = vadd.f32 %v946_v34, %v945_v45 }
 0x14d   :  { %v949_v43 = vadd.f32 %v948_v39, %v947_v38  ;;  %v752_v9 = vadd.f32 %v751_v31, %v750_v37 }
 0x14f   :  { %v754_v12 = vadd.f32 %v753_v42, %v752_v9  ;;  %v951_v54 = vadd.f32 %v950_v24, %v949_v43 }
 0x151   :  { %v953_v40 = vadd.f32 %v952_v57, %v951_v54  ;;  %v756_v49 = vadd.f32 %v755_v25, %v754_v12 }
 0x153   :  { %v758_v2 = vadd.f32 %v757_v3, %v756_v49  ;;  %v955_v58 = vadd.f32 %v954_v55, %v953_v40 }
 0x155   :  { %v957_v63 = vadd.f32 %v956_v61, %v955_v58  ;;  %v760_v60 = vadd.f32 %v759_v21, %v758_v2 }
 0x157   :  { %v762_v50 = vadd.f32 %v761_v51, %v760_v60  ;;  %v959_v18 = vadd.f32 %v958_v0, %v957_v63 }
 0x159   :  { %v961_v5 = vadd.f32 %v960_v1, %v959_v18  ;;  %v764_v6 = vadd.f32 %v763_v10, %v762_v50 }
 0x15b   :  { %v766_v8 = vadd.f32 %v765_v53, %v764_v6  ;;  %v963_v13 = vadd.f32 %v962_v7, %v961_v5 }
 0x15d   :  { %v768_v19 = vadd.f32 %v767_v15, %v766_v8  ;;  %v965_v46 = vadd.f32 %v964_v14, %v963_v13 }
 0x15f   :  { %v967_v22 = vadd.f32 %v966_v4, %v965_v46  ;;  %v769_v23 = vrot.slane %v768_v19, 4 }
 0x161   :  { %v770_v30 = vadd.f32 %v769_v23, %v768_v19  ;;  %v968_v48 = vrot.slane %v967_v22, 4 }
 0x163   :  { %v771_v26 = vrot.slane %v770_v30, 2  ;;  %v969_v28 = vadd.f32 %v968_v48, %v967_v22 }
 0x165   :  { %v772_v27 = vadd.f32 %v771_v26, %v770_v30  ;;  %v970_v11 = vrot.slane %v969_v28, 2 }
 0x167   :  { %v773_v29 = vrot.slane %v772_v27, 1  ;;  %v971_v17 = vadd.f32 %v970_v11, %v969_v28 }
 0x169   :  { %v774_v59 = vadd.f32 %v773_v29, %v772_v27  ;;  %v972_v41 = vrot.slane %v971_v17, 1 }
 0x16b   :  { %776 = vst.msk [vmem:[#allocation2] sm:$0x1] %vm775_vm5, %v774_v59  ;;  %v973_v45 = vadd.f32 %v972_v41, %v971_v17 }
 0x16c   :  { %1669 = shalt.err (!%p1666_p4)
}
 0x16d   :  { %s1670_s21 = scalar_lea.hbm %s2510_s3, 16 }
 0x16e   :  { %p1671_p5 = scmp.ne.s32.totalorder %s2510_s3, %s1670_s21  ;;  %p1674_p6 = scmp.lt.u32.totalorder %s1670_s21, %s2510_s3 }
 0x170   :  { %p1676_p7 = pnand %p1674_p6, %p1671_p5 }
 0x172   :  { %1679 = shalt.err (!%p1676_p7)
}
 0x173   :  { %1307 = dma.vmem_to_hbm [thread:$0]  %s1305_s15, 16, %s2510_s3, [#allocation3]   ;;  %974 = vst.msk [vmem:[#allocation4] sm:$0x1] %vm775_vm5, %v973_v45 }
 0x174   :  { %s1680_s0 = scalar_lea.vmem %s2474_s17, 16  ;;  %s1684_s28 = scalar_lea.vmem %s2474_s17, 32 }
 0x175   :  { %p1681_p8 = scmp.ne.s32.totalorder %s2474_s17, %s1680_s0  ;;  %p1685_p9 = scmp.lt.s32.totalorder %s2474_s17, %s2474_s17 }
 0x176   :  { %p1686_p10 = scmp.lt.s32.totalorder %s1684_s28, %s1680_s0 }
 0x178   :  { %p1687_p11 = por %p1686_p10, %p1685_p9 }
 0x17a   :  { %p1688_p12 = pnand %p1687_p11, %p1681_p8 }
 0x17c   :  { %1691 = shalt.err (!%p1688_p12)
}
 0x17d   :  { %s1692_s5 = scalar_lea.hbm %s2511_s4, 16 }
 0x17e   :  { %p1693_p13 = scmp.ne.s32.totalorder %s2511_s4, %s1692_s5  ;;  %p1696_p0 = scmp.lt.u32.totalorder %s1692_s5, %s2511_s4 }
 0x180   :  { %p1698_p1 = pnand %p1696_p0, %p1693_p13 }
 0x182   :  { %1701 = shalt.err (!%p1698_p1)
}
 0x183   :  { %1317 = dma.vmem_to_hbm [thread:$0]  %s2474_s17, 16, %s2511_s4, [#allocation5]  }
 0x184   :  { %1702 = dma.done.wait [#allocation3], 16  }
 0x185   :  { %1703 = vsyncadd [#allocation3], 4294967280 }
 0x186   :  { %1704 = dma.done.wait [#allocation5], 16  }
 0x187   :  { %1705 = vsyncadd [#allocation5], 4294967280 }
 0x188   :  { %1326 = vsyncpa [#allocation3], 1 }
 0x189   :  { %1327 = vsyncpa [#allocation5], 1 }

</bundles_post_ra>
